<compile_context>
chip_gen: v7x
topology: tpu7x:2x2x1
jax: 0.10.0
libtpu: 0.0.40
codegen_flags: <defaults>
</compile_context>

<pallas_src>
import numpy as np
import jax
import jax.numpy as jnp
from jax.experimental import pallas as pl
from jax.experimental.pallas import tpu as pltpu

IN_FEATURES = 91        # affine1 input dim (nn.Linear(91, 256))
HIDDEN = 256            # affine1 output dim
NUM_OUTPUTS = 6         # actor head size (num_outputs)
OUT_W = 8               # fused head width: lanes 0..5 probs, lane 6 value, lane 7 zero
WEIGHT_DTYPE = jnp.bfloat16


def _round_up(n, m):
    return ((n + m - 1) // m) * m


def actor_critic_kernel(x_ref, w1_ref, b1_ref, wh_ref, bh_ref, out_ref):
    # x: [TB, 91] f32 straight from HBM; cast to bf16 for the MXU.
    x = x_ref[...].astype(w1_ref.dtype)

    # affine1 + ReLU  (bf16 MXU, f32 accumulate / VPU math)
    h = jnp.dot(x, w1_ref[...], preferred_element_type=jnp.float32) + b1_ref[...]
    h = jnp.maximum(h, 0.0)                                       # [TB, 256] f32

    # fused actor+critic head: one [256, 8] matmul
    head = jnp.dot(h.astype(wh_ref.dtype), wh_ref[...],
                   preferred_element_type=jnp.float32) + bh_ref[...]   # [TB, 8]

    # softmax over lanes 0..NUM_OUTPUTS-1 only
    lane = jax.lax.broadcasted_iota(jnp.int32, head.shape, dimension=1)
    actor_mask = lane < NUM_OUTPUTS
    logits = jnp.where(actor_mask, head, jnp.float32(-1e30))
    m = jnp.max(logits, axis=-1, keepdims=True)
    e = jnp.exp(logits - m)            # masked lanes underflow to exactly 0
    s = jnp.sum(e, axis=-1, keepdims=True)
    probs = e / s                      # exact divide -> rows sum to 1

    # lanes 0..5 = probs, lane 6 = value, lane 7 = 0 (zero weights + zero bias)
    out_ref[...] = jnp.where(actor_mask, probs, head).astype(out_ref.dtype)


def actor_critic_forward(x, prepared, *, tb=1024):
    """x: [B, 91] float32 -> (action_prob [B, 6], state_values [B, 1])."""
    w1_p, b1_p, wh, bh = prepared
    B = x.shape[0]

    # Batch tile: multiple of 8 (f32 sublane packing), capped at `tb`, and kept
    # small enough that the grid has >= 2 steps when the batch allows it (so
    # the "parallel" axis actually shards across v7x's two TensorCores).
    B_round = _round_up(B, 8)
    TB = min(tb, B_round)
    if B_round >= 16:
        TB = min(TB, _round_up((B_round + 1) // 2, 8))
    B_pad = _round_up(B, TB)
    if B_pad != B:
        x = jnp.pad(x, ((0, B_pad - B), (0, 0)))   # batch pad only (no feature pad)
    grid = (B_pad // TB,)

    # VMEM limit sized from the actual footprint (+ headroom for temporaries).
    weight_bytes = (w1_p.size * w1_p.dtype.itemsize + b1_p.size * b1_p.dtype.itemsize
                    + wh.size * wh.dtype.itemsize + bh.size * bh.dtype.itemsize)
    working = (2 * TB * IN_FEATURES * 4      # x, double-buffered
               + 2 * TB * OUT_W * 4          # out, double-buffered
               + 2 * weight_bytes            # resident weights (buffer pair)
               + 6 * TB * HIDDEN * 4)        # h / head / softmax temporaries headroom
    vmem_limit = int(min(100 * 1024 * 1024, max(8 * 1024 * 1024, 2 * working)))

    out = pl.pallas_call(
        actor_critic_kernel,
        out_shape=jax.ShapeDtypeStruct((B_pad, OUT_W), jnp.float32),
        grid=grid,
        in_specs=[
            pl.BlockSpec((TB, IN_FEATURES), lambda i: (i, 0)),      # x: tiled over batch
            pl.BlockSpec((IN_FEATURES, HIDDEN), lambda i: (0, 0)),  # w1: VMEM-resident
            pl.BlockSpec((1, HIDDEN), lambda i: (0, 0)),            # b1
            pl.BlockSpec((HIDDEN, OUT_W), lambda i: (0, 0)),        # fused head weights
            pl.BlockSpec((1, OUT_W), lambda i: (0, 0)),             # fused head bias
        ],
        out_specs=pl.BlockSpec((TB, OUT_W), lambda i: (i, 0)),
        compiler_params=pltpu.CompilerParams(
            dimension_semantics=("parallel",),   # megacore on v7x
            vmem_limit_bytes=vmem_limit,
        ),
    )(x, w1_p, b1_p, wh, bh)

    probs = out[:B, :NUM_OUTPUTS]
    values = out[:B, NUM_OUTPUTS:NUM_OUTPUTS + 1]
    return probs, values


def init_params(key):
    """Logical (unpadded, f32) params mirroring weights_init /
    normalized_columns_initializer. Weights stored as [in, out]."""
    k1, k2, k3 = jax.random.split(key, 3)

    # affine1: uniform(-b, b), b = sqrt(6 / (fan_in + fan_out)); bias = 0
    w_bound = float(np.sqrt(6.0 / (IN_FEATURES + HIDDEN)))
    w1 = jax.random.uniform(k1, (IN_FEATURES, HIDDEN), jnp.float32,
                            minval=-w_bound, maxval=w_bound)
    b1 = jnp.zeros((HIDDEN,), jnp.float32)

    # actor_linear: normalized-columns init, std=0.01
    wa = jax.random.normal(k2, (HIDDEN, NUM_OUTPUTS), jnp.float32)
    wa = wa * (0.01 / jnp.sqrt(jnp.sum(wa * wa, axis=0, keepdims=True)))
    ba = jnp.zeros((NUM_OUTPUTS,), jnp.float32)

    # critic_linear: normalized-columns init, std=1.0
    wc = jax.random.normal(k3, (HIDDEN, 1), jnp.float32)
    wc = wc * (1.0 / jnp.sqrt(jnp.sum(wc * wc, axis=0, keepdims=True)))
    bc = jnp.zeros((1,), jnp.float32)

    return (w1, b1, wa, ba, wc, bc)


def prepare_params(params, weight_dtype=WEIGHT_DTYPE):
    """Fuse actor+critic head into one [256, 8] weight and one [1, 8] bias;
    cast matmul weights to bf16 (biases stay f32)."""
    w1, b1, wa, ba, wc, bc = params

    w1_p = w1.astype(weight_dtype)                       # [91, 256]
    b1_p = b1.reshape(1, HIDDEN).astype(jnp.float32)     # [1, 256]

    wh = jnp.zeros((HIDDEN, OUT_W), jnp.float32)
    wh = wh.at[:, :NUM_OUTPUTS].set(wa).at[:, NUM_OUTPUTS].set(wc[:, 0])
    wh = wh.astype(weight_dtype)                         # [256, 8]

    bh = jnp.zeros((1, OUT_W), jnp.float32)
    bh = bh.at[0, :NUM_OUTPUTS].set(ba).at[0, NUM_OUTPUTS].set(bc[0])

    return (w1_p, b1_p, wh, bh)


def reference_forward(x, prepared):
    """Pure-JAX reference using the same prepared (fused/bf16) params."""
    w1_p, b1_p, wh, bh = prepared
    xb = x.astype(w1_p.dtype)
    h = jnp.maximum(jnp.dot(xb, w1_p, preferred_element_type=jnp.float32) + b1_p, 0.0)
    head = jnp.dot(h.astype(wh.dtype), wh, preferred_element_type=jnp.float32) + bh
    probs = jax.nn.softmax(head[:, :NUM_OUTPUTS], axis=-1)
    values = head[:, NUM_OUTPUTS:NUM_OUTPUTS + 1]
    return probs, values


if __name__ == "__main__":
    key = jax.random.PRNGKey(0)
    k_params, k_x = jax.random.split(key)

    B = 8
    x = jax.random.normal(k_x, (B, IN_FEATURES), jnp.float32)
    params = init_params(k_params)
    prepared = prepare_params(params)

    probs, values = actor_critic_forward(x, prepared)
    probs = jax.block_until_ready(probs)
    values = jax.block_until_ready(values)

    ref_probs, ref_values = reference_forward(x, prepared)
    # bf16 weights -> loosened tolerance vs exact f32 bits (same prepared
    # params on both sides, so the real gap is tiny).
    np.testing.assert_allclose(np.asarray(probs), np.asarray(ref_probs),
                               rtol=2e-2, atol=2e-2)
    np.testing.assert_allclose(np.asarray(values), np.asarray(ref_values),
                               rtol=2e-2, atol=2e-2)
    assert probs.shape == (B, NUM_OUTPUTS) and values.shape == (B, 1)
    # exact divide in-kernel -> probabilities sum to ~1 per row
    np.testing.assert_allclose(np.asarray(probs).sum(axis=-1), np.ones(B),
                               rtol=1e-3, atol=1e-3)

    print("KERNEL_OK")
</pallas_src>

<mosaic_0001>
module attributes {stable_mosaic.version = 11 : i64} {
  func.func @actor_critic_kernel(%arg0: i32, %arg1: memref<8x91xf32, #tpu.memory_space<vmem>>, %arg2: memref<91x256xbf16, #tpu.memory_space<vmem>>, %arg3: memref<1x256xf32, #tpu.memory_space<vmem>>, %arg4: memref<256x8xbf16, #tpu.memory_space<vmem>>, %arg5: memref<1x8xf32, #tpu.memory_space<vmem>>, %arg6: memref<8x8xf32, #tpu.memory_space<vmem>>) attributes {dimension_semantics = [#tpu.dimension_semantics<parallel>], iteration_bounds = array<i64: 1>, scalar_prefetch = 0 : i64, scratch_operands = 0 : i64, tpu.core_type = #tpu.core_type<tc>, window_params = [{transform_indices = @transform_0, window_bounds = array<i64: 8, 91>}, {pipeline_mode = #tpu.pipeline_mode<synchronous>, transform_indices = @transform_1, window_bounds = array<i64: 91, 256>}, {pipeline_mode = #tpu.pipeline_mode<synchronous>, transform_indices = @transform_2, window_bounds = array<i64: 1, 256>}, {pipeline_mode = #tpu.pipeline_mode<synchronous>, transform_indices = @transform_3, window_bounds = array<i64: 256, 8>}, {pipeline_mode = #tpu.pipeline_mode<synchronous>, transform_indices = @transform_4, window_bounds = array<i64: 1, 8>}, {transform_indices = @transform_5, window_bounds = array<i64: 8, 8>}]} {
    %c0 = arith.constant 0 : index
    %c0_0 = arith.constant 0 : index
    %0 = vector.load %arg1[%c0, %c0_0] : memref<8x91xf32, #tpu.memory_space<vmem>>, vector<8x91xf32>
    %1 = arith.truncf %0 : vector<8x91xf32> to vector<8x91xbf16>
    %c0_1 = arith.constant 0 : index
    %c0_2 = arith.constant 0 : index
    %2 = vector.load %arg2[%c0_1, %c0_2] : memref<91x256xbf16, #tpu.memory_space<vmem>>, vector<91x256xbf16>
    %cst = arith.constant dense<0.000000e+00> : vector<8x256xf32>
    %3 = tpu.matmul %1, %2, %cst {dimension_numbers = #tpu.dot_dimension_numbers<[1], [0], [0], [1], [0, 0, 1, 1], [], []>} : vector<8x91xbf16>, vector<91x256xbf16>, vector<8x256xf32> -> vector<8x256xf32>
    %c0_3 = arith.constant 0 : index
    %c0_4 = arith.constant 0 : index
    %4 = vector.load %arg3[%c0_3, %c0_4] : memref<1x256xf32, #tpu.memory_space<vmem>>, vector<1x256xf32>
    %5 = vector.broadcast %4 : vector<1x256xf32> to vector<8x256xf32>
    %6 = arith.addf %3, %5 : vector<8x256xf32>
    %cst_5 = arith.constant 0.000000e+00 : f32
    %7 = vector.broadcast %cst_5 : f32 to vector<8x256xf32>
    %8 = arith.maximumf %6, %7 : vector<8x256xf32>
    %9 = arith.truncf %8 : vector<8x256xf32> to vector<8x256xbf16>
    %c0_6 = arith.constant 0 : index
    %c0_7 = arith.constant 0 : index
    %10 = vector.load %arg4[%c0_6, %c0_7] : memref<256x8xbf16, #tpu.memory_space<vmem>>, vector<256x8xbf16>
    %cst_8 = arith.constant dense<0.000000e+00> : vector<8x8xf32>
    %11 = tpu.matmul %9, %10, %cst_8 {dimension_numbers = #tpu.dot_dimension_numbers<[1], [0], [0], [1], [0, 0, 1, 1], [], []>} : vector<8x256xbf16>, vector<256x8xbf16>, vector<8x8xf32> -> vector<8x8xf32>
    %c0_9 = arith.constant 0 : index
    %c0_10 = arith.constant 0 : index
    %12 = vector.load %arg5[%c0_9, %c0_10] : memref<1x8xf32, #tpu.memory_space<vmem>>, vector<1x8xf32>
    %13 = vector.broadcast %12 : vector<1x8xf32> to vector<8x8xf32>
    %14 = arith.addf %11, %13 : vector<8x8xf32>
    %15 = tpu.iota {dimensions = array<i32: 1>} : vector<8x8xi32>
    %c6_i32 = arith.constant 6 : i32
    %16 = vector.broadcast %c6_i32 : i32 to vector<8x8xi32>
    %17 = arith.cmpi slt, %15, %16 : vector<8x8xi32>
    %cst_11 = arith.constant -1.000000e+30 : f32
    %18 = vector.broadcast %cst_11 : f32 to vector<8x8xf32>
    %19 = arith.select %17, %14, %18 : vector<8x8xi1>, vector<8x8xf32>
    %cst_12 = arith.constant dense<0xFF800000> : vector<8xf32>
    %20 = vector.multi_reduction <maximumf>, %19, %cst_12 [1] : vector<8x8xf32> to vector<8xf32>
    %21 = vector.shape_cast %20 : vector<8xf32> to vector<8x1xf32>
    %22 = vector.broadcast %21 : vector<8x1xf32> to vector<8x8xf32>
    %23 = arith.subf %19, %22 : vector<8x8xf32>
    %24 = math.exp %23 : vector<8x8xf32>
    %cst_13 = arith.constant dense<0.000000e+00> : vector<8xf32>
    %25 = vector.multi_reduction <add>, %24, %cst_13 [1] : vector<8x8xf32> to vector<8xf32>
    %26 = vector.shape_cast %25 : vector<8xf32> to vector<8x1xf32>
    %27 = vector.broadcast %26 : vector<8x1xf32> to vector<8x8xf32>
    %28 = arith.divf %24, %27 : vector<8x8xf32>
    %29 = arith.select %17, %28, %14 : vector<8x8xi1>, vector<8x8xf32>
    %c0_14 = arith.constant 0 : index
    %c0_15 = arith.constant 0 : index
    %30 = vector.load %arg6[%c0_14, %c0_15] : memref<8x8xf32, #tpu.memory_space<vmem>>, vector<8x8xf32>
    tpu.vector_store %arg6[%c0_14, %c0_15], %29 {strides = array<i32>} : memref<8x8xf32, #tpu.memory_space<vmem>>, vector<8x8xf32>,
    return
  }
  func.func @transform_0(%arg0: i32) -> (i32, i32) {
    %c0_i32 = arith.constant 0 : i32
    %c0_i32_0 = arith.constant 0 : i32
    return %arg0, %c0_i32 : i32, i32
  }
  func.func @transform_1(%arg0: i32) -> (i32, i32) {
    %c0_i32 = arith.constant 0 : i32
    %c0_i32_0 = arith.constant 0 : i32
    %c0_i32_1 = arith.constant 0 : i32
    return %c0_i32, %c0_i32_0 : i32, i32
  }
  func.func @transform_2(%arg0: i32) -> (i32, i32) {
    %c0_i32 = arith.constant 0 : i32
    %c0_i32_0 = arith.constant 0 : i32
    %c0_i32_1 = arith.constant 0 : i32
    return %c0_i32, %c0_i32_0 : i32, i32
  }
  func.func @transform_3(%arg0: i32) -> (i32, i32) {
    %c0_i32 = arith.constant 0 : i32
    %c0_i32_0 = arith.constant 0 : i32
    %c0_i32_1 = arith.constant 0 : i32
    return %c0_i32, %c0_i32_0 : i32, i32
  }
  func.func @transform_4(%arg0: i32) -> (i32, i32) {
    %c0_i32 = arith.constant 0 : i32
    %c0_i32_0 = arith.constant 0 : i32
    %c0_i32_1 = arith.constant 0 : i32
    return %c0_i32, %c0_i32_0 : i32, i32
  }
  func.func @transform_5(%arg0: i32) -> (i32, i32) {
    %c0_i32 = arith.constant 0 : i32
    %c0_i32_0 = arith.constant 0 : i32
    return %arg0, %c0_i32 : i32, i32
  }
}

</mosaic_0001>

<bundles_post_ra>
// kernel: tpu_custom_call.1
= control target key start
LH: loop header
LB: loop body
LE: loop exit
PB: predicated region body
PF: predicated region fallthrough
CT: control target
= control target key end

     0   :  { %v489_v3 = vmov 0   ;;  %vm110_vm0 = vcmask 1044480   ;;  %vm111_vm1 = vcmask 1045504   ;;  %v490_v12 = vmov 65535   ;;  %s632_s0 = inlined_call_operand.vmem [shape: f32[8,91], index: 0, kind: input, shape index: {}]   ;;  %s633_s1 = inlined_call_operand.vmem [shape: bf16[91,256], index: 1, kind: input, shape index: {}]   ;;  %s634_s2 = inlined_call_operand.vmem [shape: f32[1,256], index: 2, kind: input, shape index: {}]   ;;  %s635_s3 = inlined_call_operand.vmem [shape: bf16[256,8], index: 3, kind: input, shape index: {}]   ;;  %s636_s4 = inlined_call_operand.vmem [shape: f32[1,8], index: 4, kind: input, shape index: {}]   ;;  %s637_s5 = inlined_call_operand.hbm [shape: f32[8,8], index: 5, kind: output, shape index: {}]  }
   0x1   :  { %v427_v0 = vld [vmem:[%s633_s1 + $0x4] ss:$8 sps:$4 sm:$0xff]   ;;  %v429_v1 = vld [vmem:[%s633_s1] ss:$8 sps:$4 sm:$0xff]   ;;  %v430_v2 = vld [vmem:[%s633_s1 + $0x14] ss:$8 sps:$4 sm:$0xff]   ;;  %152 = vmatprep.mubr.bf16.mxu0 %v489_v3 }
   0x2   :  { %120 = vmatprep.subr.bf16.mxu0 %v427_v0  ;;  %v432_v4 = vld [vmem:[%s633_s1 + $0x10] ss:$8 sps:$4 sm:$0xff]   ;;  %v433_v5 = vld [vmem:[%s633_s1 + $0x24] ss:$8 sps:$4 sm:$0xff]   ;;  %v435_v6 = vld [vmem:[%s633_s1 + $0x20] ss:$8 sps:$4 sm:$0xff]  }
   0x3   :  { %121 = vmatpush1.bf16.msra.mxu0 %v429_v1  ;;  %v436_v7 = vld [vmem:[%s633_s1 + $0x34] ss:$8 sps:$4 sm:$0xff]   ;;  %v445_v8 = vld [vmem:[%s635_s3 + $0x40] sm:$0xff]   ;;  %v438_v9 = vld [vmem:[%s633_s1 + $0x30] ss:$8 sps:$4 sm:$0xff]   ;;  %v112_v13 = vsel %vm110_vm0, 4294967295, %v490_v12 }
   0x4   :  { %122 = vmatprep.subr.bf16.mxu0 %v430_v2  ;;  %v439_v10 = vld [vmem:[%s633_s1 + $0x44] ss:$8 sps:$4 sm:$0xff]   ;;  %v442_v11 = vld [vmem:[%s633_s1 + $0x54] ss:$8 sps:$4 sm:$0x3f]   ;;  %402 = vmatprep.subr.bf16.mxu1 %v445_v8  ;;  %v113_v17 = vsel %vm111_vm1, %v112_v13, 0 }
   0x5   :  { %v446_v14 = vld [vmem:[%s635_s3] sm:$0xff]   ;;  %v447_v15 = vld [vmem:[%s635_s3 + $0x48] sm:$0xff]   ;;  %v444_v18 = vld [vmem:[%s633_s1 + $0x50] ss:$8 sps:$4 sm:$0x3f]   ;;  %v118_v21 = vand.u32 %v442_v11, %v113_v17  ;;  %vm106_vm2 = vcmask 744448  }
   0x6   :  { %403 = vmatpush3.bf16.msra.mxu1 %v446_v14  ;;  %v448_v16 = vld [vmem:[%s635_s3 + $0x8] sm:$0xff]   ;;  %v449_v19 = vld [vmem:[%s635_s3 + $0x50] sm:$0xff]   ;;  %v451_v23 = vld [vmem:[%s635_s3 + $0x58] sm:$0xff]   ;;  %v115_v24 = vand.u32 %v444_v18, %v113_v17 }
   0x7   :  { %123 = vmatpush1.bf16.msra.mxu0 %v432_v4  ;;  %404 = vmatprep.subr.bf16.mxu1 %v447_v15  ;;  %v441_v20 = vld [vmem:[%s633_s1 + $0x40] ss:$8 sps:$4 sm:$0xff]   ;;  %v450_v22 = vld [vmem:[%s635_s3 + $0x10] sm:$0xff]   ;;  %v452_v26 = vld [vmem:[%s635_s3 + $0x18] sm:$0xff]  }
   0x8   :  { %124 = vmatprep.subr.bf16.mxu0 %v433_v5  ;;  %v22_v25 = vld [vmem:[%s632_s0] sm:$0xff] }
   0x9   :  { %v453_v27 = vld [vmem:[%s635_s3 + $0x60] sm:$0xff]   ;;  %v23_v28 = vpack.c.bf16 %v22_v25, %v22_v25 }
   0xa   :  { %405 = vmatpush3.bf16.msra.mxu1 %v448_v16 }
   0xb   :  { %125 = vmatpush1.bf16.msra.mxu0 %v435_v6  ;;  %406 = vmatprep.subr.bf16.mxu1 %v449_v19 }
   0xc   :  { %126 = vmatprep.subr.bf16.mxu0 %v436_v7 }
   0xe   :  { %407 = vmatpush3.bf16.msra.mxu1 %v450_v22 }
   0xf   :  { %127 = vmatpush1.bf16.msra.mxu0 %v438_v9  ;;  %408 = vmatprep.subr.bf16.mxu1 %v451_v23 }
  0x10   :  { %128 = vmatprep.subr.bf16.mxu0 %v439_v10 }
  0x13   :  { %129 = vmatpush1.bf16.msra.mxu0 %v441_v20 }
  0x14   :  { %130 = vmatprep.subr.bf16.mxu0 %v118_v21 }
  0x17   :  { %131 = vmatpush1.bf16.msra.mxu0 %v115_v24 }
  0x18   :  { %10 = vsyncpa [#allocation3], 0  ;;  %409 = vmatpush3.bf16.msra.mxu1 %v452_v26  ;;  %v454_v29 = vld [vmem:[%s635_s3 + $0x20] sm:$0xff]   ;;  %v455_v30 = vld [vmem:[%s635_s3 + $0x68] sm:$0xff]   ;;  %v38_v36 = vlaneseq  ;;  %vm344_vm4 = vcmask 64512  }
  0x19   :  { %410 = vmatprep.subr.bf16.mxu1 %v453_v27  ;;  %v456_v31 = vld [vmem:[%s635_s3 + $0x28] sm:$0xff]   ;;  %v457_v32 = vld [vmem:[%s635_s3 + $0x70] sm:$0xff]   ;;  %v459_v34 = vld [vmem:[%s635_s3 + $0x78] sm:$0xff]  }
  0x1a   :  { %384 = vmatmul.mubr.msk.bf16.vlgmr.msra.gmra.mrb[0].mxu0 %vm106_vm2, %v23_v28  ;;  %v458_v33 = vld [vmem:[%s635_s3 + $0x30] sm:$0xff]   ;;  %v460_v35 = vld [vmem:[%s635_s3 + $0x38] sm:$0xff]   ;;  %v39_v37 = vshrl.u32 %v38_v36, 7  ;;  %v36_v39 = vld [vmem:[%s634_s2] sm:$0x3]  ;;  %v341_v53 = vand.u32 127, %v38_v36 }
  0x1b   :  { %v385_v55 = vld [vmem:[%s636_s4] ss:$0 sm:$0xff]  ;;  %s491_s2 = smov [#allocation2]  }
  0x1c   :  { %411 = vmatpush3.bf16.msra.mxu1 %v454_v29  ;;  %v40_v38 = vsub.s32 0, %v39_v37  ;;  %v44_v40 = vsub.s32 1, %v39_v37  ;;  %vm342_vm3 = vcmp.lt.s32.totalorder %v341_v53, 6  ;;  %s364_s4 = sshll.u32 %s491_s2, 4  ;;  %s365_s4 = int_to_ptr.vmem [resolvable:$true] %s364_s4 }
  0x1d   :  { %412 = vmatprep.subr.bf16.mxu1 %v455_v30  ;;  %s465_s27 = scalar_lea.vmem %s365_s4, 128  ;;  %p470_p1 = scmp.lt.s32.totalorder %s365_s4, %s365_s4 }
  0x1e   :  { %v41_v41 = vrot.slane %v36_v39, %v40_v38  ;;  %v45_v42 = vrot.slane %v36_v39, %v44_v40  ;;  %p466_p0 = scmp.ne.s32.totalorder %s365_s4, %s465_s27  ;;  %p471_p2 = scmp.lt.s32.totalorder %s465_s27, %s465_s27 }
  0x20   :  { %413 = vmatpush3.bf16.msra.mxu1 %v456_v31  ;;  %p472_p3 = por %p471_p2, %p470_p1 }
  0x21   :  { %414 = vmatprep.subr.bf16.mxu1 %v457_v32 }
  0x22   :  { %p473_p4 = pnand %p472_p3, %p466_p0 }
  0x24   :  { %415 = vmatpush3.bf16.msra.mxu1 %v458_v33 }
  0x25   :  { %416 = vmatprep.subr.bf16.mxu1 %v459_v34 }
  0x28   :  { %417 = vmatpush3.bf16.msra.mxu1 %v460_v35 }
  0xed   :  { %v154_v43 = vpop.f32.mrb[0].mxu0 }
  0xee   :  { %v155_v44 = vadd.f32 %v154_v43, %v41_v41  ;;  %v156_v45 = vpop.f32.mrb[1].mxu0 }
  0xef   :  { %v157_v46 = vadd.f32 %v156_v45, %v45_v42  ;;  %v158_v47 = vpop.f32.mrb[2].mxu0 }
  0xf0   :  { %v161_v48 = vmax.f32 %v155_v44, 0.0  ;;  %v159_v49 = vpop.f32.mrb[3].mxu0 }
  0xf1   :  { %v162_v50 = vmax.f32 %v157_v46, 0.0 }
  0xf2   :  { %v163_v52 = vpack.c.bf16 %v161_v48, %v161_v48 }
  0xf3   :  { %v164_v51 = vpack.c.bf16 %v162_v50, %v162_v50 }
  0xf5   :  { %332 = vmatprep.mubr.bf16.mxu1 %v164_v51 }
  0xf6   :  { %333 = vmatmul.mubr.bf16.vlgmr.msra.gmra.mrb[0].mxu1 %v163_v52 }
 0x1c9   :  { %v418_v54 = vpop.f32.mrb[0].mxu1 }
 0x1ca   :  { %v419_v56 = vpop.f32.mrb[1].mxu1 }
 0x1cb   :  { %v420_v57 = vadd.f32 %v419_v56, %v418_v54  ;;  %v421_v58 = vpop.f32.mrb[2].mxu1 }
 0x1cc   :  { %v422_v59 = vpop.f32.mrb[3].mxu1 }
 0x1cd   :  { %v335_v60 = vadd.f32 %v420_v57, %v385_v55 }
 0x1cf   :  { %v343_v61 = vsel %vm342_vm3, %v335_v60, -1e+30 }
 0x1d0   :  { %v345_v62 = vsel %vm344_vm4, %v343_v61, -inf }
 0x1d1   :  { %346 = vmax.xlane.f32.xlu0 %v345_v62 }
 0x25e   :  { %v347_v63 = vpop.xlane.xlu0 %346 }
 0x25f   :  { %v348_v0 = vsub.f32 %v343_v61, %v347_v63 }
 0x261   :  { %v349_v1 = vmul.f32 1.442695, %v348_v0 }
 0x263   :  { %461 = vpow2.f32 %v349_v1 }
 0x26d   :  { %v462_v2 = vpop.eup %461 }
 0x26e   :  { %v351_v3 = vsel %vm344_vm4, %v462_v2, 0.0 }
 0x26f   :  { %352 = vadd.xlane.f32.xlu0 %v351_v3 }
 0x2fc   :  { %v353_v4 = vpop.xlane.xlu0 %352 }
 0x2fd   :  { %463 = vrcp.f32 %v353_v4 }
 0x307   :  { %v464_v5 = vpop.eup %463 }
 0x308   :  { %v355_v6 = vmul.f32 %v464_v5, %v462_v2 }
 0x30a   :  { %v356_v7 = vsel %vm342_vm3, %v355_v6, %v335_v60 }
 0x30b   :  { %357 = vst.msk [vmem:[#allocation2] sm:$0xff] %vm344_vm4, %v356_v7 }
 0x30c   :  { %476 = shalt.err (!%p473_p4)
}
 0x30d   :  { %s477_s30 = scalar_lea.hbm %s637_s5, 128 }
 0x30e   :  { %p478_p5 = scmp.ne.s32.totalorder %s637_s5, %s477_s30  ;;  %p481_p6 = scmp.lt.u32.totalorder %s477_s30, %s637_s5 }
 0x310   :  { %p483_p7 = pnand %p481_p6, %p478_p5 }
 0x312   :  { %486 = shalt.err (!%p483_p7)
}
 0x313   :  { %367 = dma.vmem_to_hbm [thread:$0]  %s365_s4, 128, %s637_s5, [#allocation3]  }
 0x314   :  { %487 = dma.done.wait [#allocation3], 128  }
 0x315   :  { %488 = vsyncadd [#allocation3], 4294967168 }
 0x316   :  { %371 = vsyncpa [#allocation3], 1 }

</bundles_post_ra>
